<compile_context>
chip_gen: v5e
topology: v5e:2x2
jax: 0.10.0
libtpu: 0.0.40
codegen_flags: <defaults>
</compile_context>

<pallas_src>
import jax
import jax.numpy as jnp
from jax import lax
from jax.experimental import pallas as pl
from jax.experimental.pallas import tpu as pltpu


# ---------------------------------------------------------------------------
# Kernel 1: complex conv as ONE wide matmul per grid step + fused BN stats.
# ---------------------------------------------------------------------------
def _cconv_stats_kernel(x_ref, w_ref, y_ref, stat_ref):
    """x_ref    : (Mt, Kpad)   rows are (image, out-row) pairs; K folds kh,
                               both complex input paths and Wp*Cin (zero
                               padded to a lane multiple).
       w_ref    : (Kpad, Ct)   Toeplitz / complex-sign-folded weights for this
                               column block ([w, part(r/i), cout] columns).
       y_ref    : (Mt, Ct)     conv output columns.
       stat_ref : (1, 2, Ct)   row 0 = column sums, row 1 = column sum-squares
                               (reduced to per-channel BN stats in the wrapper).
    """
    acc = jnp.dot(x_ref[...], w_ref[...], preferred_element_type=jnp.float32)
    y_ref[...] = acc.astype(y_ref.dtype)
    s = jnp.sum(acc, axis=0, keepdims=True)
    ss = jnp.sum(acc * acc, axis=0, keepdims=True)
    stat_ref[0] = jnp.concatenate([s, ss], axis=0)


# ---------------------------------------------------------------------------
# Kernel 2: affine BN (precomputed scale/shift) + ReLU, lane-dense row tiles.
# ---------------------------------------------------------------------------
def _bn_relu_kernel(y_ref, scale_ref, shift_ref, o_ref):
    y = y_ref[...].astype(jnp.float32)
    o_ref[...] = jnp.maximum(y * scale_ref[...] + shift_ref[...],
                             0.0).astype(o_ref.dtype)


# ---------------------------------------------------------------------------
# Wrapper-side layout helpers (run once per forward, tiny).
# ---------------------------------------------------------------------------
def _round_up(x, m):
    return ((x + m - 1) // m) * m


def _largest_divisor_tile(total, target, step=8):
    """Largest multiple of `step` dividing `total` and <= target (else total)."""
    best = None
    t = step
    while t <= min(total, target):
        if total % t == 0:
            best = t
        t += step
    return total if best is None else best


def _build_lhs(x_r, x_i, ks, pad, k_pad, dtype):
    """LHS rows: (N*H, Kpad) with K layout [kh][path(r/i)][wi][ci], zero padded."""
    n, cin, h, w = x_r.shape
    hp, wp = h + 2 * pad, w + 2 * pad

    def rows(x):
        xh = jnp.transpose(x, (0, 2, 3, 1))                      # NHWC
        xp = jnp.pad(xh, ((0, 0), (pad, pad), (pad, pad), (0, 0)))
        return xp.reshape(n, hp, wp * cin)

    xr, xi = rows(x_r), rows(x_i)
    pieces = []
    for kh in range(ks):                                         # kh folded into K
        pieces.append(xr[:, kh:kh + h, :])
        pieces.append(xi[:, kh:kh + h, :])
    lhs = jnp.concatenate(pieces, axis=-1)                       # (N, H, ks*2*WpC)
    k0 = ks * 2 * wp * cin
    if k_pad > k0:
        lhs = jnp.pad(lhs, ((0, 0), (0, 0), (0, k_pad - k0)))
    return lhs.reshape(n * h, k_pad).astype(dtype)


def _build_rhs(w_r, w_i, ks, w, pad, k_pad, dtype):
    """RHS: (Kpad, W*2*Cout).  Row layout matches _build_lhs; complex signs
    are folded in so one matmul yields both yr and yi columns."""
    cout, cin = w_r.shape[0], w_r.shape[1]
    wp = w + 2 * pad
    wpc = wp * cin
    c2 = w * 2 * cout

    def path_weight(w_a, w_b):
        # base[kh, kw, ci, part*Cout+co]
        base = jnp.concatenate([jnp.transpose(w_a, (2, 3, 1, 0)),
                                jnp.transpose(w_b, (2, 3, 1, 0))],
                               axis=-1).astype(jnp.float32)
        out5 = jnp.zeros((ks, cin, 2 * cout, wp, w), jnp.float32)
        w_idx = jnp.arange(w)
        for kw in range(ks):
            out5 = out5.at[:, :, :, w_idx + kw, w_idx].set(base[:, kw][..., None])
        # -> (ks, Wp, Cin, W, 2*Cout) -> (ks, WpC, C2)
        return jnp.transpose(out5, (0, 3, 1, 4, 2)).reshape(ks, wpc, c2)

    wr_path = path_weight(w_r, w_i)          # x_r path:  [ w_r |  w_i ]
    wi_path = path_weight(-w_i, w_r)         # x_i path:  [-w_i |  w_r ]
    rhs = jnp.concatenate([jnp.stack([wr_path[kh], wi_path[kh]], axis=0)
                           for kh in range(ks)], axis=0)         # (ks*2, WpC, C2)
    rhs = rhs.reshape(ks * 2 * wpc, c2)
    k0 = ks * 2 * wpc
    if k_pad > k0:
        rhs = jnp.pad(rhs, ((0, k_pad - k0), (0, 0)))
    return rhs.astype(dtype)


# ---------------------------------------------------------------------------
# Forward pass.
# ---------------------------------------------------------------------------
def cconv2d_bn_relu(x_r, x_i, params, ks=3, pad=1, eps=1e-5,
                    compute_dtype=jnp.bfloat16):
    """CConv2d_BN_RELU forward.  NCHW float32 in / out.

    compute_dtype: dtype of MXU operands AND of the stored conv intermediate.
    Accumulation and BN statistics stay float32 regardless.
    """
    N, Cin, H, W = x_r.shape
    Cout = params["w_r"].shape[0]
    Wp = W + 2 * pad
    C2 = W * 2 * Cout                          # lane-dense conv output width
    K0 = ks * 2 * Wp * Cin
    Kpad = _round_up(K0, 128)                  # lane-aligned contraction dim
    rows = N * H
    out_dtype = x_r.dtype

    x_big = _build_lhs(x_r, x_i, ks, pad, Kpad, compute_dtype)         # (rows, Kpad)
    w_big = _build_rhs(params["w_r"], params["w_i"], ks, W, pad, Kpad,
                       compute_dtype)                                  # (Kpad, C2)

    # --- Conv kernel tiling: big M tile, cap live f32 accumulator <=128 KiB. -
    m_target = max(8, min(256, (128 * 1024) // (4 * C2)))
    M_TILE = _largest_divisor_tile(rows, m_target)
    NB = rows // M_TILE
    # Tiny grids (demo N=2): split columns so both v7x TensorCores get work.
    NC = 2 if (NB < 2 and C2 % 256 == 0) else 1
    Ct = C2 // NC

    x_spec = pl.BlockSpec((M_TILE, Kpad), lambda c, b: (b, 0))
    w_spec = pl.BlockSpec((Kpad, Ct), lambda c, b: (0, c))
    y_spec = pl.BlockSpec((M_TILE, Ct), lambda c, b: (b, c))
    stat_spec = pl.BlockSpec((1, 2, Ct), lambda c, b: (b, 0, c))

    y_flat, stats = pl.pallas_call(
        _cconv_stats_kernel,
        out_shape=(jax.ShapeDtypeStruct((rows, C2), compute_dtype),
                   jax.ShapeDtypeStruct((NB, 2, C2), jnp.float32)),
        grid_spec=pltpu.PrefetchScalarGridSpec(
            num_scalar_prefetch=0,
            grid=(NC, NB),
            in_specs=[x_spec, w_spec],
            out_specs=(y_spec, stat_spec)),
        compiler_params=pltpu.CompilerParams(
            dimension_semantics=("parallel", "parallel")),
    )(x_big, w_big)

    # --- Fold per-column stats to per-channel BN scale/shift (O(W*Cout)). ---
    count = float(N * H * W)
    s_c = jnp.sum(stats[:, 0, :], axis=0).reshape(W, 2, Cout).sum(axis=0)
    ss_c = jnp.sum(stats[:, 1, :], axis=0).reshape(W, 2, Cout).sum(axis=0)
    mean = s_c / count                                        # (2, Cout)
    var = jnp.maximum(ss_c / count - mean * mean, 0.0)        # biased (training BN)
    gamma = jnp.stack([params["gamma_r"], params["gamma_i"]]).astype(jnp.float32)
    beta = jnp.stack([params["beta_r"], params["beta_i"]]).astype(jnp.float32)
    scale = gamma * lax.rsqrt(var + eps)                      # (2, Cout)
    shift = beta - mean * scale
    scale_cols = jnp.broadcast_to(scale[None], (W, 2, Cout)).reshape(1, C2)
    shift_cols = jnp.broadcast_to(shift[None], (W, 2, Cout)).reshape(1, C2)

    # --- Tiled affine BN + ReLU apply pass (HBM-bound; big lane-dense tiles). -
    TR = min(512, rows)
    n_blk = pl.cdiv(rows, TR)

    o_flat = pl.pallas_call(
        _bn_relu_kernel,
        out_shape=jax.ShapeDtypeStruct((rows, C2), out_dtype),
        grid_spec=pltpu.PrefetchScalarGridSpec(
            num_scalar_prefetch=0,
            grid=(n_blk,),
            in_specs=[pl.BlockSpec((TR, C2), lambda i: (i, 0)),
                      pl.BlockSpec((1, C2), lambda i: (0, 0)),
                      pl.BlockSpec((1, C2), lambda i: (0, 0))],
            out_specs=pl.BlockSpec((TR, C2), lambda i: (i, 0))),
        compiler_params=pltpu.CompilerParams(
            dimension_semantics=("parallel",)),
    )(y_flat, scale_cols, shift_cols)

    # Final NCHW conversion stays in XLA (output is tiny relative to the conv
    # work; keeping the lane-dense layout would be preferable for a fused
    # consumer).
    o = o_flat.reshape(N, H, W, 2, Cout)
    out_r = jnp.transpose(o[:, :, :, 0, :], (0, 3, 1, 2))
    out_i = jnp.transpose(o[:, :, :, 1, :], (0, 3, 1, 2))
    return out_r, out_i


# ---------------------------------------------------------------------------
# Pure-JAX reference (training-mode BN, includes the conv biases to prove
# their cancellation by batch-mean subtraction).
# ---------------------------------------------------------------------------
def _reference(x_r, x_i, params, pad=1, eps=1e-5):
    def conv(x, w, b):
        y = lax.conv_general_dilated(
            x, w, window_strides=(1, 1), padding=((pad, pad), (pad, pad)),
            dimension_numbers=("NCHW", "OIHW", "NCHW"),
            precision=lax.Precision.HIGHEST)
        return y + b[None, :, None, None]

    rr = conv(x_r, params["w_r"], params["b_r"])
    ii = conv(x_i, params["w_i"], params["b_i"])
    ri = conv(x_r, params["w_i"], params["b_i"])
    ir = conv(x_i, params["w_r"], params["b_r"])
    yr, yi = rr - ii, ri + ir

    def bn_relu(y, gamma, beta):
        mean = jnp.mean(y, axis=(0, 2, 3), keepdims=True)
        var = jnp.mean(jnp.square(y - mean), axis=(0, 2, 3), keepdims=True)
        y_hat = (y - mean) * lax.rsqrt(var + eps)
        return jnp.maximum(y_hat * gamma[None, :, None, None]
                           + beta[None, :, None, None], 0.0)

    return (bn_relu(yr, params["gamma_r"], params["beta_r"]),
            bn_relu(yi, params["gamma_i"], params["beta_i"]))


if __name__ == "__main__":
    # Shapes consistent with the module: num_in=4, num_out=8, ks=3, pad=1.
    N, Cin, H, W = 2, 4, 16, 16
    Cout, ks, pad = 8, 3, 1

    key = jax.random.PRNGKey(0)
    keys = jax.random.split(key, 10)
    params = {
        "w_r": jax.random.normal(keys[0], (Cout, Cin, ks, ks), jnp.float32) * 0.1,
        "w_i": jax.random.normal(keys[1], (Cout, Cin, ks, ks), jnp.float32) * 0.1,
        # Biases exist in the module; training-mode BN cancels them (checked
        # against the reference, which applies them explicitly).
        "b_r": jax.random.normal(keys[2], (Cout,), jnp.float32) * 0.1,
        "b_i": jax.random.normal(keys[3], (Cout,), jnp.float32) * 0.1,
        "gamma_r": 1.0 + 0.1 * jax.random.normal(keys[4], (Cout,), jnp.float32),
        "beta_r": 0.1 * jax.random.normal(keys[5], (Cout,), jnp.float32),
        "gamma_i": 1.0 + 0.1 * jax.random.normal(keys[6], (Cout,), jnp.float32),
        "beta_i": 0.1 * jax.random.normal(keys[7], (Cout,), jnp.float32),
    }

    x_r = jax.random.normal(keys[8], (N, Cin, H, W), jnp.float32)
    x_i = jax.random.normal(keys[9], (N, Cin, H, W), jnp.float32)

    ref_r, ref_i = _reference(x_r, x_i, params, pad=pad)

    # Default (bf16 MXU operands + bf16 intermediate): loose tolerance.
    out_r, out_i = cconv2d_bn_relu(x_r, x_i, params, ks=ks, pad=pad)
    jax.block_until_ready((out_r, out_i))
    assert out_r.shape == (N, Cout, H, W) and out_i.shape == (N, Cout, H, W)
    assert jnp.allclose(out_r, ref_r, atol=5e-2, rtol=5e-2)
    assert jnp.allclose(out_i, ref_i, atol=5e-2, rtol=5e-2)

    # Full-f32 path: tight tolerance against the f32 reference.
    out_r32, out_i32 = cconv2d_bn_relu(x_r, x_i, params, ks=ks, pad=pad,
                                       compute_dtype=jnp.float32)
    jax.block_until_ready((out_r32, out_i32))
    assert jnp.allclose(out_r32, ref_r, atol=2e-3, rtol=2e-3)
    assert jnp.allclose(out_i32, ref_i, atol=2e-3, rtol=2e-3)

    print("KERNEL_OK")
</pallas_src>

<mosaic_0001>
module attributes {stable_mosaic.version = 11 : i64} {
  func.func @_cconv_stats_kernel(%arg0: i32, %arg1: i32, %arg2: memref<32x512xbf16, #tpu.memory_space<vmem>>, %arg3: memref<512x128xbf16, #tpu.memory_space<vmem>>, %arg4: memref<32x128xbf16, #tpu.memory_space<vmem>>, %arg5: memref<1x2x128xf32, #tpu.memory_space<vmem>>) attributes {dimension_semantics = [#tpu.dimension_semantics<parallel>, #tpu.dimension_semantics<parallel>], iteration_bounds = array<i64: 2, 1>, scalar_prefetch = 0 : i64, scratch_operands = 0 : i64, tpu.core_type = #tpu.core_type<tc>, window_params = [{transform_indices = @transform_0, window_bounds = array<i64: 32, 512>}, {transform_indices = @transform_1, window_bounds = array<i64: 512, 128>}, {transform_indices = @transform_2, window_bounds = array<i64: 32, 128>}, {transform_indices = @transform_3, window_bounds = array<i64: 1, 2, 128>}]} {
    %c0 = arith.constant 0 : index
    %c0_0 = arith.constant 0 : index
    %0 = vector.load %arg2[%c0, %c0_0] : memref<32x512xbf16, #tpu.memory_space<vmem>>, vector<32x512xbf16>
    %c0_1 = arith.constant 0 : index
    %c0_2 = arith.constant 0 : index
    %1 = vector.load %arg3[%c0_1, %c0_2] : memref<512x128xbf16, #tpu.memory_space<vmem>>, vector<512x128xbf16>
    %cst = arith.constant dense<0.000000e+00> : vector<32x128xf32>
    %2 = tpu.matmul %0, %1, %cst {dimension_numbers = #tpu.dot_dimension_numbers<[1], [0], [0], [1], [0, 0, 1, 1], [], []>} : vector<32x512xbf16>, vector<512x128xbf16>, vector<32x128xf32> -> vector<32x128xf32>
    %3 = arith.truncf %2 : vector<32x128xf32> to vector<32x128xbf16>
    %c0_3 = arith.constant 0 : index
    %c0_4 = arith.constant 0 : index
    %4 = vector.load %arg4[%c0_3, %c0_4] : memref<32x128xbf16, #tpu.memory_space<vmem>>, vector<32x128xbf16>
    tpu.vector_store %arg4[%c0_3, %c0_4], %3 {strides = array<i32>} : memref<32x128xbf16, #tpu.memory_space<vmem>>, vector<32x128xbf16>,
    %cst_5 = arith.constant dense<0.000000e+00> : vector<128xf32>
    %5 = vector.multi_reduction <add>, %2, %cst_5 [0] : vector<32x128xf32> to vector<128xf32>
    %6 = vector.shape_cast %5 : vector<128xf32> to vector<1x128xf32>
    %7 = arith.mulf %2, %2 : vector<32x128xf32>
    %cst_6 = arith.constant dense<0.000000e+00> : vector<128xf32>
    %8 = vector.multi_reduction <add>, %7, %cst_6 [0] : vector<32x128xf32> to vector<128xf32>
    %9 = vector.shape_cast %8 : vector<128xf32> to vector<1x128xf32>
    %10 = tpu.concatenate %6, %9 in 0 : vector<1x128xf32>, vector<1x128xf32> -> vector<2x128xf32>
    %c0_7 = arith.constant 0 : index
    %c0_8 = arith.constant 0 : index
    %c0_9 = arith.constant 0 : index
    %11 = vector.load %arg5[%c0_7, %c0_8, %c0_9] : memref<1x2x128xf32, #tpu.memory_space<vmem>>, vector<1x2x128xf32>
    %12 = vector.shape_cast %11 : vector<1x2x128xf32> to vector<2x128xf32>
    %13 = vector.shape_cast %10 : vector<2x128xf32> to vector<1x2x128xf32>
    tpu.vector_store %arg5[%c0_7, %c0_8, %c0_9], %13 {strides = array<i32>} : memref<1x2x128xf32, #tpu.memory_space<vmem>>, vector<1x2x128xf32>,
    return
  }
  func.func @transform_0(%arg0: i32, %arg1: i32) -> (i32, i32) {
    %c0_i32 = arith.constant 0 : i32
    %c0_i32_0 = arith.constant 0 : i32
    return %arg1, %c0_i32 : i32, i32
  }
  func.func @transform_1(%arg0: i32, %arg1: i32) -> (i32, i32) {
    %c0_i32 = arith.constant 0 : i32
    %c0_i32_0 = arith.constant 0 : i32
    return %c0_i32, %arg0 : i32, i32
  }
  func.func @transform_2(%arg0: i32, %arg1: i32) -> (i32, i32) {
    %c0_i32 = arith.constant 0 : i32
    return %arg1, %arg0 : i32, i32
  }
  func.func @transform_3(%arg0: i32, %arg1: i32) -> (i32, i32, i32) {
    %c0_i32 = arith.constant 0 : i32
    %c0_i32_0 = arith.constant 0 : i32
    return %arg1, %c0_i32, %arg0 : i32, i32, i32
  }
}

</mosaic_0001>

<bundles_post_ra>
// kernel: tpu_custom_call.1
= control target key start
LH: loop header
LB: loop body
LE: loop exit
PB: predicated region body
PF: predicated region fallthrough
CT: control target
= control target key end

     0   :  { %s1556_s0 = inlined_call_operand.hbm [shape: bf16[32,512], index: 0, kind: input, shape index: {}]   ;;  %s1557_s1 = inlined_call_operand.hbm [shape: bf16[512,256], index: 1, kind: input, shape index: {}]   ;;  %s1558_s2 = inlined_call_operand.hbm [shape: bf16[32,256], index: 2, kind: output, shape index: {0}]   ;;  %s1559_s3 = inlined_call_operand.hbm [shape: f32[1,2,256], index: 3, kind: output, shape index: {1}]  }
   0x1   :  { %1560 = sst [smem:[#allocation14_spill]] %s1556_s0 }
   0x2   :  { %9 = vsyncpa [#allocation3], 0 }
   0x3   :  { %10 = vsyncpa [#allocation6], 0 }
   0x4   :  { %12 = vsyncpa [#allocation6 + $0x1], 0 }
   0x5   :  { %13 = vsyncpa [#allocation4], 0 }
   0x6   :  { %15 = vsyncpa [#allocation4 + $0x1], 0 }
   0x7   :  { %16 = vsyncpa [#allocation9], 0 }
   0x8   :  { %18 = vsyncpa [#allocation9 + $0x1], 0  ;;  %s1353_s12 = smov 0   ;;  %s1355_s13 = smov 0  }
   0x9   :  { %s1357_s14 = smov 0   ;;  %s1359_s15 = smov 0  }
   0xa   :  { %s1361_s16 = smov 0   ;;  %s1363_s17 = smov 0  }
   0xb LB: > { %s829_s18 = sadd.s32 4294967295, %s1322_s17   ;;  %s830_s19 = sadd.s32 4294967294, %s1322_s17   ;;  %s1322_s17 = sphi %s1363_s17, %s24_s17   ;;  %s1318_s16 = sphi %s1361_s16, %s1573_s16   ;;  %s1314_s15 = sphi %s1359_s15, %s1572_s15   ;;  %s1310_s14 = sphi %s1357_s14, %s1571_s14   ;;  %s1306_s13 = sphi %s1355_s13, %s1570_s13   ;;  %s1302_s12 = sphi %s1353_s12, %s1569_s12  }
   0xc   : > { %p82_p0 = scmp.ne.s32.totalorder %s1306_s13, %s1302_s12  ;;  %p1387_p1 = scmp.eq.s32.totalorder %s829_s18, 0 }
   0xd   : > { %p1391_p2 = scmp.eq.s32.totalorder %s829_s18, 1  ;;  %p114_p3 = scmp.eq.s32.totalorder %s830_s19, 1 }
   0xe   : > { %p1397_p4 = por %p1387_p1, %p82_p0  ;;  %p831_p5 = scmp.ge.s32.totalorder %s1322_s17, 1 }
   0xf   : > { %p1402_p6 = por %p114_p3, %p82_p0  ;;  %p149_p7 = scmp.lt.s32.totalorder %s1322_s17, 3 }
  0x10   : > { %s1565_s0 = sld [smem:[#allocation14_spill]]  ;;  %s1324_s28 = smov [#allocation2]  }
  0x11   : > { %p1410_p8 = pnand %p831_p5, %p149_p7  ;;  %s166_s29 = sshll.u32 %s1324_s28, 4  ;;  %s167_s29 = int_to_ptr.vmem [resolvable:$true] %s166_s29 }
  0x12   : > { %p833_p11 = scmp.ge.s32.totalorder %s1322_s17, 2  ;;  %s1325_s30 = smov 256  }
  0x13   : > { %p1068_p9 = pneg %p1410_p8  ;;  %s1326_s4 = smov 16  }
  0x14   : > { %s36_s5 = sadd.s32 1, %s1318_s16  ;;  %s69_s6 = sadd.s32 1, %s1310_s14 }
  0x15   : > { %p1069_p10 = pnand %p1068_p9, %p1387_p1  ;;  %p38_p12 = scmp.ge.s32.totalorder %s36_s5, 2 }
  0x16   : > { %s164_s26 = sshll.u32 %s1565_s0, 4  ;;  %p76_p13 = scmp.ne.s32.totalorder %s1310_s14, %s1306_s13  ;;  %s165_s26 = int_to_ptr.hbm [resolvable:$true] %s164_s26 }
  0x17   : > { %1071 = dma.hbm_to_vmem [thread:$0]  (!%p1069_p10), %s165_s26, 1024, %s167_s29, [#allocation3], %s1325_s30, %s1325_s30, %s1326_s4  }
  0x18   : > { %p77_p0 = scmp.eq.s32.totalorder %s1322_s17, 0  ;;  %s1575_s5 = smov (%p38_p12, %s36_s5), 0 }
  0x19   : > { %p1432_p5 = por %p1391_p2, %p76_p13  ;;  %s66_s9 = ssub.s32 %s1318_s16, %s1575_s5 }
  0x1a   : > { %p1426_p3 = por %p77_p0, %p76_p13  ;;  %p1084_p7 = scmp.lt.s32.totalorder %s1322_s17, 2 }
  0x1b   : > { %p67_p9 = scmp.eq.s32.totalorder %s66_s9, 0  ;;  %s180_s10 = sand.u32 1, %s1310_s14  }
  0x1c   : > { %s834_s11 = sshll.u32 %s180_s10, 8  ;;  %s835_s19 = sshll.u32 %s1318_s16, 2 }
  0x1d   : > { %s1441_s18 = scalar_select %p67_p9, %s1310_s14, %s69_s6  }
  0x1e   : > { %s188_s26 = scalar_lea.hbm %s1557_s1, %s835_s19  ;;  %s184_s28 = scalar_lea.vmem [#allocation5], %s834_s11 }
  0x1f   : > { %s191_s29 = sshll.u32 %s184_s28, 4  ;;  %s189_s21 = sshll.u32 %s188_s26, 4  ;;  %s192_s29 = int_to_ptr.vmem [resolvable:$true] %s191_s29  ;;  %s190_s21 = int_to_ptr.hbm [resolvable:$true] %s189_s21 }
  0x20   : > { %p1073_p2 = pnand %p1084_p7, %p1426_p3  ;;  %s181_s30 = scalar_lea.sflag [#allocation6], %s180_s10 }
  0x21   : > { %s1327_s4 = smov 128   ;;  %s1328_s0 = smov 64  }
  0x22   : > { %s1329_s9 = smov 4   ;;  %203 = sbr.rel (%p1410_p8) target bundleno = 260 (0x104), region = 28 }
  0x23   : > { %1075 = dma.hbm_to_vmem [thread:$0]  (!%p1073_p2), %s190_s21, 4096, %s192_s29, %s181_s30, %s1327_s4, %s1328_s0, %s1329_s9  }
  0x27   : > { %1285 = dma.done.wait (%p1387_p1), [#allocation3], 1024  }
  0x28   : > { %1287 = vsyncadd (%p1387_p1), [#allocation3], 4294966272  ;;  %s1456_s6 = sand.u32 1, %s1306_s13  }
  0x29   : > { %s838_s7 = sshll.u32 %s1456_s6, 8  ;;  %s211_s10 = scalar_lea.sflag [#allocation6], %s1456_s6 }
  0x2a   : > { %s1460_s11 = scalar_lea.vmem [#allocation5], %s838_s7 }
  0x2b   : > { %1289 = dma.done.wait (%p1397_p4), %s211_s10, 4096  }
  0x2c   : > { %1291 = vsyncadd (%p1397_p4), %s211_s10, 4294963200  ;;  %v1022_v0 = vld [vmem:[%s1460_s11 + $0x38] sm:$0xff]  ;;  %v1021_v4 = vld [vmem:[%s1460_s11 + $0x30] sm:$0xff]  ;;  %s839_s0 = sshll.u32 %s1456_s6, 4  ;;  %s1003_s22 = sshll.u32 %s1314_s15, 2 }
  0x2d   : > { %v1030_v1 = vld [vmem:[%s1460_s11 + $0x78] sm:$0xff]  ;;  %549 = vmatpush.bf16.msra.mxu0 %v1022_v0  ;;  %v1029_v5 = vld [vmem:[%s1460_s11 + $0x70] sm:$0xff]  ;;  %v1020_v8 = vld [vmem:[%s1460_s11 + $0x28] sm:$0xff]  ;;  %s235_s20 = scalar_lea.vmem [#allocation7], %s839_s0  ;;  %s677_s24 = scalar_lea.hbm %s1558_s2, %s1003_s22 }
  0x2e   : > { %v1038_v2 = vld [vmem:[%s1460_s11 + $0xb8] sm:$0xff]  ;;  %568 = vmatpush.bf16.msra.mxu1 %v1030_v1  ;;  %v1037_v6 = vld [vmem:[%s1460_s11 + $0xb0] sm:$0xff]  ;;  %v1028_v9 = vld [vmem:[%s1460_s11 + $0x68] sm:$0xff]  ;;  %s678_s25 = sshll.u32 %s235_s20, 4  ;;  %s680_s26 = sshll.u32 %s677_s24, 4  ;;  %s1503_s25 = int_to_ptr.vmem [resolvable:$true] %s678_s25  ;;  %s681_s26 = int_to_ptr.hbm [resolvable:$true] %s680_s26 }
  0x2f   : > { %v1046_v3 = vld [vmem:[%s1460_s11 + $0xf8] sm:$0xff]  ;;  %587 = vmatpush.bf16.msra.mxu2 %v1038_v2  ;;  %v1045_v7 = vld [vmem:[%s1460_s11 + $0xf0] sm:$0xff]  ;;  %v1036_v10 = vld [vmem:[%s1460_s11 + $0xa8] sm:$0xff]  ;;  %s659_s28 = scalar_lea.sflag [#allocation4], %s1456_s6  ;;  %s1218_s29 = sshra.s32 %s681_s26, 4  ;;  %s1219_s29 = int_to_ptr.hbm [resolvable:$true] %s1218_s29 }
  0x30   : > { %606 = vmatpush.bf16.msra.mxu3 %v1046_v3  ;;  %v1044_v11 = vld [vmem:[%s1460_s11 + $0xe8] sm:$0xff]  ;;  %v1019_v12 = vld [vmem:[%s1460_s11 + $0x20] sm:$0xff]  ;;  %v1018_v16 = vld [vmem:[%s1460_s11 + $0x18] sm:$0xff]  ;;  %s1220_s21 = scalar_lea.hbm %s1219_s29, 16  ;;  %s1224_s9 = scalar_lea.hbm %s1558_s2, 32 }
  0x31   : > { %550 = vmatpush.bf16.msra.mxu0 %v1021_v4  ;;  %v1027_v13 = vld [vmem:[%s1460_s11 + $0x60] sm:$0xff]  ;;  %v1026_v17 = vld [vmem:[%s1460_s11 + $0x58] sm:$0xff]  ;;  %v1017_v20 = vld [vmem:[%s1460_s11 + $0x10] sm:$0xff]  ;;  %p1221_p1 = scmp.ne.s32.totalorder %s1219_s29, %s1220_s21  ;;  %p1225_p10 = scmp.lt.s32.totalorder %s1219_s29, %s1558_s2 }
  0x32   : > { %569 = vmatpush.bf16.msra.mxu1 %v1029_v5  ;;  %v1035_v14 = vld [vmem:[%s1460_s11 + $0xa0] sm:$0xff]  ;;  %v1034_v18 = vld [vmem:[%s1460_s11 + $0x98] sm:$0xff]  ;;  %v1025_v21 = vld [vmem:[%s1460_s11 + $0x50] sm:$0xff]  ;;  %p1226_p12 = scmp.lt.s32.totalorder %s1224_s9, %s1220_s21 }
  0x33   : > { %588 = vmatpush.bf16.msra.mxu2 %v1037_v6  ;;  %v1043_v15 = vld [vmem:[%s1460_s11 + $0xe0] sm:$0xff]  ;;  %v1042_v19 = vld [vmem:[%s1460_s11 + $0xd8] sm:$0xff]  ;;  %v1033_v22 = vld [vmem:[%s1460_s11 + $0x90] sm:$0xff]  ;;  %p1222_p4 = pnand %p1221_p1, %p1432_p5 }
  0x34   : > { %607 = vmatpush.bf16.msra.mxu3 %v1045_v7  ;;  %v1041_v23 = vld [vmem:[%s1460_s11 + $0xd0] sm:$0xff]  ;;  %v1016_v24 = vld [vmem:[%s1460_s11 + $0x8] sm:$0xff]  ;;  %v1015_v28 = vld [vmem:[%s1460_s11] sm:$0xff]  ;;  %p1227_p13 = por %p1226_p12, %p1225_p10 }
  0x35   : > { %551 = vmatpush.bf16.msra.mxu0 %v1020_v8  ;;  %v1024_v25 = vld [vmem:[%s1460_s11 + $0x48] sm:$0xff]  ;;  %v1023_v29 = vld [vmem:[%s1460_s11 + $0x40] sm:$0xff]  ;;  %v1009_v33 = vld [vmem:[#allocation2 + $0xc] sm:$0xf0]  ;;  %p1223_p8 = pneg %p1222_p4 }
  0x36   : > { %570 = vmatpush.bf16.msra.mxu1 %v1028_v9  ;;  %v1032_v26 = vld [vmem:[%s1460_s11 + $0x88] sm:$0xff]  ;;  %v1031_v30 = vld [vmem:[%s1460_s11 + $0x80] sm:$0xff]  ;;  %v845_v35 = vld [vmem:[#allocation2 + $0x10] sm:$0xf0] }
  0x37   : > { %589 = vmatpush.bf16.msra.mxu2 %v1036_v10  ;;  %v1040_v27 = vld [vmem:[%s1460_s11 + $0xc8] sm:$0xff]  ;;  %v1039_v31 = vld [vmem:[%s1460_s11 + $0xc0] sm:$0xff]  ;;  %v1010_v37 = vld [vmem:[#allocation2 + $0x14] sm:$0xf0]  ;;  %p1228_p0 = pnand %p1227_p13, %p1223_p8 }
  0x38   : > { %608 = vmatpush.bf16.msra.mxu3 %v1044_v11  ;;  %v843_v32 = vld [vmem:[#allocation2] sm:$0xf]  ;;  %v1007_v34 = vld [vmem:[#allocation2 + $0x4] sm:$0xf]  ;;  %v851_v36 = vld [vmem:[#allocation2 + $0x8] sm:$0xf] }
  0x39   : > { %552 = vmatpush.bf16.msra.mxu0 %v1019_v12  ;;  %v1008_v38 = vld [vmem:[#allocation2 + $0xc] sm:$0xf]  ;;  %v853_v39 = vld [vmem:[#allocation2 + $0x18] sm:$0xf0]  ;;  %v844_v40 = vor.u32 %v1009_v33, %v843_v32  ;;  %v848_v41 = vor.u32 %v1007_v34, %v845_v35  ;;  %v852_v42 = vor.u32 %v1010_v37, %v851_v36  ;;  %v859_v44 = vld [vmem:[#allocation2 + $0x20] sm:$0xf] }
  0x3a   : > { %571 = vmatpush.bf16.msra.mxu1 %v1027_v13  ;;  %v856_v43 = vor.u32 %v1008_v38, %v853_v39  ;;  %v1013_v45 = vld [vmem:[#allocation2 + $0x2c] sm:$0xf0]  ;;  %v1011_v46 = vld [vmem:[#allocation2 + $0x24] sm:$0xf]  ;;  %v861_v47 = vld [vmem:[#allocation2 + $0x30] sm:$0xf0] }
  0x3b   : > { %590 = vmatpush.bf16.msra.mxu2 %v1035_v14  ;;  %v867_v48 = vld [vmem:[#allocation2 + $0x28] sm:$0xf]  ;;  %v1014_v49 = vld [vmem:[#allocation2 + $0x34] sm:$0xf0]  ;;  %v1012_v50 = vld [vmem:[#allocation2 + $0x2c] sm:$0xf]  ;;  %v860_v52 = vor.u32 %v1013_v45, %v859_v44  ;;  %v864_v53 = vor.u32 %v1011_v46, %v861_v47 }
  0x3c   : > { %609 = vmatpush.bf16.msra.mxu3 %v1043_v15  ;;  %v869_v51 = vld [vmem:[#allocation2 + $0x38] sm:$0xf0]  ;;  %v868_v54 = vor.u32 %v1014_v49, %v867_v48 }
  0x3d   : > { %553 = vmatpush.bf16.msra.mxu0 %v1018_v16  ;;  %v872_v55 = vor.u32 %v1012_v50, %v869_v51 }
  0x3e   : > { %572 = vmatpush.bf16.msra.mxu1 %v1026_v17 }
  0x3f   : > { %591 = vmatpush.bf16.msra.mxu2 %v1034_v18 }
  0x40   : > { %610 = vmatpush.bf16.msra.mxu3 %v1042_v19 }
  0x41   : > { %554 = vmatpush.bf16.msra.mxu0 %v1017_v20 }
  0x42   : > { %573 = vmatpush.bf16.msra.mxu1 %v1025_v21 }
  0x43   : > { %592 = vmatpush.bf16.msra.mxu2 %v1033_v22 }
  0x44   : > { %611 = vmatpush.bf16.msra.mxu3 %v1041_v23 }
  0x45   : > { %555 = vmatpush.bf16.msra.mxu0 %v1016_v24 }
  0x46   : > { %574 = vmatpush.bf16.msra.mxu1 %v1024_v25 }
  0x47   : > { %593 = vmatpush.bf16.msra.mxu2 %v1032_v26 }
  0x48   : > { %612 = vmatpush.bf16.msra.mxu3 %v1040_v27 }
  0x49   : > { %556 = vmatpush.bf16.msra.mxu0 %v1015_v28 }
  0x4a   : > { %575 = vmatpush.bf16.msra.mxu1 %v1023_v29 }
  0x4b   : > { %594 = vmatpush.bf16.msra.mxu2 %v1031_v30 }
  0x4c   : > { %613 = vmatpush.bf16.msra.mxu3 %v1039_v31  ;;  %557 = vmatmul.bf16.vlgmr.msra.gmra.mxu0 %v844_v40 }
  0x4d   : > { %576 = vmatmul.bf16.vlgmr.msra.gmra.mxu1 %v848_v41 }
  0x4e   : > { %595 = vmatmul.bf16.vlgmr.msra.gmra.mxu2 %v852_v42 }
  0x4f   : > { %614 = vmatmul.bf16.vlgmr.msra.gmra.mxu3 %v856_v43 }
  0x5c   : > { %562 = vmatmul.bf16.gmra.mxu0 %v860_v52 }
  0x5d   : > { %581 = vmatmul.bf16.gmra.mxu1 %v864_v53 }
  0x5e   : > { %600 = vmatmul.bf16.gmra.mxu2 %v868_v54 }
  0x5f   : > { %619 = vmatmul.bf16.gmra.mxu3 %v872_v55 }
  0xc9   : > { %v558_v56 = vpop.f32.mrf.mxu0 }
  0xca   : > { %v577_v57 = vpop.f32.mrf.mxu1 }
  0xcb   : > { %v578_v62 = vadd.f32 %v577_v57, %v558_v56 }
  0xd1   : > { %v596_v58 = vpop.f32.mrf.mxu2  ;;  %v560_v60 = vpop.f32.mrf.mxu0 }
  0xd2   : > { %v615_v59 = vpop.f32.mrf.mxu3  ;;  %v579_v61 = vpop.f32.mrf.mxu1  ;;  %v597_v63 = vadd.f32 %v596_v58, %v578_v62 }
  0xd3   : > { %v580_v0 = vadd.f32 %v579_v61, %v560_v60 }
  0xd4   : > { %v616_v6 = vadd.f32 %v615_v59, %v597_v63 }
  0xd6   : > { %v642_v19 = vmul.f32 %v616_v6, %v616_v6 }
  0xd9   : > { %v598_v1 = vpop.f32.mrf.mxu2  ;;  %v563_v4 = vpop.f32.mrf.mxu0 }
  0xda   : > { %v617_v2 = vpop.f32.mrf.mxu3  ;;  %v599_v3 = vadd.f32 %v598_v1, %v580_v0  ;;  %v582_v5 = vpop.f32.mrf.mxu1 }
  0xdb   : > { %v583_v9 = vadd.f32 %v582_v5, %v563_v4 }
  0xdc   : > { %v618_v7 = vadd.f32 %v617_v2, %v599_v3 }
  0xde   : > { %v1050_v8 = vpack.c.bf16 %v618_v7, %v616_v6  ;;  %v643_v16 = vmul.f32 %v618_v7, %v618_v7  ;;  %v633_v20 = vadd.f32 %v618_v7, %v616_v6 }
  0xe0   : > { %1051 = vst [vmem:[%s235_s20] sm:$0xff] %v1050_v8   ;;  %v646_v24 = vadd.f32 %v643_v16, %v642_v19 }
  0xe1   : > { %v601_v10 = vpop.f32.mrf.mxu2  ;;  %v565_v13 = vpop.f32.mrf.mxu0 }
  0xe2   : > { %v620_v11 = vpop.f32.mrf.mxu3  ;;  %v602_v12 = vadd.f32 %v601_v10, %v583_v9  ;;  %v584_v14 = vpop.f32.mrf.mxu1 }
  0xe3   : > { %v585_v17 = vadd.f32 %v584_v14, %v565_v13 }
  0xe4   : > { %v621_v15 = vadd.f32 %v620_v11, %v602_v12 }
  0xe6   : > { %v644_v21 = vmul.f32 %v621_v15, %v621_v15  ;;  %v634_v25 = vadd.f32 %v633_v20, %v621_v15 }
  0xe8   : > { %v647_v27 = vadd.f32 %v646_v24, %v644_v21 }
  0xe9   : > { %v603_v18 = vpop.f32.mrf.mxu2 }
  0xea   : > { %v604_v22 = vadd.f32 %v603_v18, %v585_v17  ;;  %v622_v23 = vpop.f32.mrf.mxu3 }
  0xec   : > { %v623_v26 = vadd.f32 %v622_v23, %v604_v22 }
  0xee   : > { %v1055_v28 = vpack.c.bf16 %v623_v26, %v621_v15  ;;  %v635_v29 = vadd.f32 %v634_v25, %v623_v26  ;;  %v645_v30 = vmul.f32 %v623_v26, %v623_v26 }
  0xf0   : > { %1057 = vst [vmem:[%s235_s20 + $0x8] sm:$0xff] %v1055_v28   ;;  %v636_v31 = vrot.slane %v635_v29, 4  ;;  %v648_v32 = vadd.f32 %v647_v27, %v645_v30 }
  0xf1   : > { %1231 = shalt.err (!%p1228_p0)
}
  0xf2   : > { %s1330_s11 = smov 64   ;;  %s1331_s0 = smov 128   ;;  %v637_v33 = vadd.f32 %v636_v31, %v635_v29  ;;  %v649_v34 = vrot.slane %v648_v32, 4  ;;  %vm655_vm0 = vcmask 1040384  }
  0xf3   : > { %s1332_s20 = smov 4   ;;  %s840_s22 = sshll.u32 %s1456_s6, 1 }
  0xf4   : > { %1064 = dma.vmem_to_hbm [thread:$0]  (%p1432_p5), %s1503_s25, 256, %s681_s26, %s659_s28, %s1330_s11, %s1331_s0, %s1332_s20   ;;  %v638_v35 = vrot.slane %v637_v33, 2  ;;  %v650_v36 = vadd.f32 %v649_v34, %v648_v32 }
  0xf5   : > { %s1004_s27 = sshll.u32 %s1314_s15, 1  ;;  %s242_s21 = scalar_lea.vmem [#allocation8], %s840_s22 }
  0xf6   : > { %v639_v37 = vadd.f32 %v638_v35, %v637_v33  ;;  %v651_v38 = vrot.slane %v650_v36, 2  ;;  %s695_s29 = scalar_lea.hbm %s1559_s3, %s1004_s27  ;;  %s697_s30 = sshll.u32 %s242_s21, 4  ;;  %s698_s30 = int_to_ptr.vmem [resolvable:$true] %s697_s30 }
  0xf7   : > { %s699_s25 = sshll.u32 %s695_s29, 4  ;;  %s664_s15 = scalar_lea.sflag [#allocation9], %s1456_s6  ;;  %s700_s25 = int_to_ptr.hbm [resolvable:$true] %s699_s25 }
  0xf8   : > { %v640_v39 = vrot.slane %v639_v37, 1  ;;  %v652_v40 = vadd.f32 %v651_v38, %v650_v36  ;;  %s1246_s26 = sshra.s32 %s700_s25, 4  ;;  %s1252_s7 = scalar_lea.hbm %s1559_s3, 4  ;;  %s1247_s26 = int_to_ptr.hbm [resolvable:$true] %s1246_s26 }
  0xf9   : > { %s1248_s28 = scalar_lea.hbm %s1247_s26, 2  ;;  %p1253_p2 = scmp.lt.s32.totalorder %s1247_s26, %s1559_s3 }
  0xfa   : > { %v653_v41 = vrot.slane %v652_v40, 1  ;;  %v641_v42 = vadd.f32 %v640_v39, %v639_v37  ;;  %p1249_p3 = scmp.ne.s32.totalorder %s1247_s26, %s1248_s28  ;;  %p1254_p1 = scmp.lt.s32.totalorder %s1252_s7, %s1248_s28 }
  0xfc   : > { %v654_v43 = vadd.f32 %v653_v41, %v652_v40  ;;  %p1250_p7 = pnand %p1249_p3, %p1432_p5  ;;  %p1255_p4 = por %p1254_p1, %p1253_p2 }
  0xfe   : > { %v656_v44 = vsel %vm655_vm0, %v641_v42, %v654_v43  ;;  %p1251_p9 = pneg %p1250_p7 }
  0xff   : > { %657 = vst [vmem:[%s242_s21] sm:$0x3] %v656_v44 }
 0x100   : > { %p1256_p8 = pnand %p1255_p4, %p1251_p9 }
 0x102   : > { %1259 = shalt.err (!%p1256_p8)
}
 0x103   : > { %1065 = dma.vmem_to_hbm [thread:$0]  (%p1432_p5), %s698_s30, 32, %s700_s25, %s664_s15  }
 0x104 PF: > { %s711_s6 = sand.u32 1, %s1302_s12   ;;  %p1077_p10 = pnand %p833_p11, %p1402_p6 }
 0x105   : > { %s712_s0 = scalar_lea.sflag [#allocation4], %s711_s6 }
 0x106   : > { %p1078_p12 = pneg %p1077_p10 }
 0x108   : > { %1293 = dma.done.wait (%p1078_p12), %s712_s0, 256  }
 0x109   : > { %1295 = vsyncadd (%p1078_p12), %s712_s0, 4294967040  ;;  %s722_s20 = scalar_lea.sflag [#allocation9], %s711_s6 }
 0x10a   : > { %1297 = dma.done.wait (%p1078_p12), %s722_s20, 32  }
 0x10b   : > { %1299 = vsyncadd (%p1078_p12), %s722_s20, 4294967264  ;;  %s24_s17 = sadd.s32 1, %s1322_s17   ;;  %s1569_s12 = smov %s1306_s13 }
 0x10c   : > { %p21_p13 = scmp.ge.s32.totalorder %s24_s17, 4   ;;  %s1570_s13 = smov %s1310_s14 }
 0x10d   : > { %s1571_s14 = smov %s1441_s18  ;;  %s1572_s15 = smov %s1318_s16 }
 0x10e   : > { %s1573_s16 = smov %s1575_s5  ;;  %23 = sbr.rel (!%p21_p13) target bundleno = 11 (0xb), region = 96 }
 0x113   :  { %728 = vsyncpa [#allocation3], 1 }
 0x114   :  { %730 = vsyncpa [#allocation3 + $0x1], 1 }
 0x115   :  { %731 = vsyncpa [#allocation6], 1 }
 0x116   :  { %733 = vsyncpa [#allocation6 + $0x1], 1 }
 0x117   :  { %734 = vsyncpa [#allocation4], 1 }
 0x118   :  { %736 = vsyncpa [#allocation4 + $0x1], 1 }
 0x119   :  { %737 = vsyncpa [#allocation9], 1 }
 0x11a   :  { %739 = vsyncpa [#allocation9 + $0x1], 1 }

</bundles_post_ra>
